<compile_context>
chip_gen: v6e
topology: v6e:2x2x1
jax: 0.10.0
libtpu: 0.0.40
codegen_flags: <defaults>
</compile_context>

<pallas_src>
import math

import jax
import jax.numpy as jnp
import numpy as np
from jax import lax
from jax.experimental import pallas as pl
from jax.experimental.pallas import tpu as pltpu


def _round_up(x, m):
    return (x + m - 1) // m * m


def _sublane(dtype):
    # sublane packing: 8 rows for 4-byte, 16 for 2-byte, 32 for 1-byte dtypes
    return max(8, 32 // np.dtype(dtype).itemsize)


def _vmem_limit_bytes(est):
    # ~2x the static working-set estimate + headroom for compiler scratch,
    # clamped so we never over-reserve v7x's 64 MiB physical VMEM.
    return int(max(32 << 20, min(2 * est + (8 << 20), 64 << 20)))


# ------------------------ tiled linear: y = x @ W.T + b ------------------------
def _matmul_step(x_ref, w_ref, acc_ref):
    k = pl.program_id(2)

    @pl.when(k == 0)
    def _():
        acc_ref[...] = jnp.zeros_like(acc_ref)

    # W block is in native (Out, In) layout -> contract the shared In (last) dims.
    acc_ref[...] += lax.dot_general(
        x_ref[...], w_ref[...],
        dimension_numbers=(((1,), (1,)), ((), ())),
        preferred_element_type=jnp.float32)


def _linear_bias_kernel(x_ref, w_ref, b_ref, o_ref, acc_ref):
    _matmul_step(x_ref, w_ref, acc_ref)

    @pl.when(pl.program_id(2) == pl.num_programs(2) - 1)
    def _():
        o_ref[...] = (acc_ref[...] + b_ref[...].astype(jnp.float32)).astype(o_ref.dtype)


def _linear_nobias_kernel(x_ref, w_ref, o_ref, acc_ref):
    _matmul_step(x_ref, w_ref, acc_ref)

    @pl.when(pl.program_id(2) == pl.num_programs(2) - 1)
    def _():
        o_ref[...] = acc_ref[...].astype(o_ref.dtype)


def _ensure_parallel_tiles(N, Out, tm, tn, sub):
    """Guarantee >=2 parallel (M, Out) tiles when possible (v7x has 2 TCs)."""
    while pl.cdiv(N, tm) * pl.cdiv(Out, tn) < 2:
        if tn >= 256 and (tn // 2) % 128 == 0:
            tn //= 2
        elif tm >= 2 * sub and (tm // 2) % sub == 0:
            tm //= 2
        else:
            break
    return tm, tn


def _linear_2d(x, w, bias, *, out_dtype, tm=512, tn=512, tk=512):
    """x: (N, In), w: (Out, In) native layout, bias: (Out,) or None -> (N, Out)."""
    N, In = x.shape
    Out = w.shape[0]
    sub = _sublane(x.dtype)

    # Cap tiles at hardware-aligned dims (dtype-aware sublane, 128-lane).
    tm = min(tm, _round_up(N, sub))
    tn = min(tn, _round_up(Out, 128))
    tk = min(tk, _round_up(In, 128))
    tm, tn = _ensure_parallel_tiles(N, Out, tm, tn, sub)

    # Alignment-only padding for M/Out (no-op when already aligned); K must be
    # zero-padded so no garbage enters the reduction.
    Np = _round_up(N, sub)
    Op = _round_up(Out, 128)
    Kp = _round_up(In, tk)

    xp = x if (Np == N and Kp == In) else jnp.pad(x, ((0, Np - N), (0, Kp - In)))
    wp = w if (Op == Out and Kp == In) else jnp.pad(w, ((0, Op - Out), (0, Kp - In)))

    grid = (pl.cdiv(Np, tm), pl.cdiv(Op, tn), Kp // tk)

    xb = x.dtype.itemsize
    wb = w.dtype.itemsize
    ob = np.dtype(out_dtype).itemsize
    est = (2 * (tm * tk * xb + tn * tk * wb)   # double-buffered inputs
           + 2 * tm * tn * ob                  # double-buffered output
           + tm * tn * 4                       # f32 accumulator scratch
           + (2 * tn * 4 if bias is not None else 0))

    common = dict(
        out_shape=jax.ShapeDtypeStruct((Np, Op), out_dtype),
        grid=grid,
        out_specs=pl.BlockSpec((tm, tn), lambda i, j, k: (i, j)),
        scratch_shapes=[pltpu.VMEM((tm, tn), jnp.float32)],
        compiler_params=pltpu.CompilerParams(
            dimension_semantics=("parallel", "parallel", "arbitrary"),
            vmem_limit_bytes=_vmem_limit_bytes(est)),
    )
    x_spec = pl.BlockSpec((tm, tk), lambda i, j, k: (i, k))
    w_spec = pl.BlockSpec((tn, tk), lambda i, j, k: (j, k))

    if bias is None:
        out = pl.pallas_call(_linear_nobias_kernel,
                             in_specs=[x_spec, w_spec], **common)(xp, wp)
    else:
        bp = bias if Op == Out else jnp.pad(bias, (0, Op - Out))
        bp = bp.reshape(1, Op)
        b_spec = pl.BlockSpec((1, tn), lambda i, j, k: (0, j))
        out = pl.pallas_call(_linear_bias_kernel,
                             in_specs=[x_spec, w_spec, b_spec], **common)(xp, wp, bp)

    if Np != N or Op != Out:
        out = out[:N, :Out]
    return out


# --------------------- one-shot basis combination (per call) -------------------
def _combine_kernel(c_ref, w_ref, o_ref):
    # c_ref: (B, 1) coefficients, w_ref: (B, blk) basis-weight chunk
    w_eff = jnp.sum(w_ref[...].astype(jnp.float32) * c_ref[...],
                    axis=0, keepdims=True)
    o_ref[...] = w_eff.astype(o_ref.dtype)


def _combine_bases(comp_row, w_flat, *, blk=256 * 1024):
    """comp_row: (B,), w_flat: (B, F) natural flattening -> (F,) combined weight."""
    B, F = w_flat.shape
    blk = min(blk, _round_up(F, 128))            # >=1-2 MiB per grid step when large
    Fp = _round_up(F, 128)
    wp = w_flat if Fp == F else jnp.pad(w_flat, ((0, 0), (0, Fp - F)))
    c2 = comp_row.reshape(B, 1).astype(jnp.float32)

    wb = w_flat.dtype.itemsize
    est = 2 * B * blk * wb + 2 * blk * wb + 2 * B * 4

    out = pl.pallas_call(
        _combine_kernel,
        out_shape=jax.ShapeDtypeStruct((1, Fp), w_flat.dtype),
        grid=(pl.cdiv(Fp, blk),),
        in_specs=[
            pl.BlockSpec((B, 1), lambda j: (0, 0)),
            pl.BlockSpec((B, blk), lambda j: (0, j)),
        ],
        out_specs=pl.BlockSpec((1, blk), lambda j: (0, j)),
        compiler_params=pltpu.CompilerParams(
            dimension_semantics=("parallel",),
            vmem_limit_bytes=_vmem_limit_bytes(est)),
    )(c2, wp)
    return out[0] if Fp == F else out[0, :F]


# --------------------------------- forward -------------------------------------
def linear_w_base_forward(x, weight, bias=None, comp=None, relation=None,
                          *, tm=512, tn=512, tk=512, compute_dtype=jnp.bfloat16):
    """Pallas forward of Linear_w_base.

    weight: (Out, In) when comp is None, else (num_bases, Out, In)
    comp  : (num_relations, num_bases) or None
    compute_dtype: MXU input dtype (default bf16); output keeps x's dtype.
    """
    *lead, In = x.shape
    x2 = x.reshape(-1, In)
    out_dtype = x.dtype            # decoupled from compute dtype

    if comp is None:
        Out = weight.shape[0]
        w = weight                                   # native (Out, In); no HBM transpose
    else:
        B, Out, _ = weight.shape
        w_flat = weight.reshape(B, Out * In)         # natural flattening; no transpose
        comp_row = comp[relation]                    # (B,) fixed per call
        w = _combine_bases(comp_row, w_flat).reshape(Out, In)

    if compute_dtype is not None:
        x2 = x2.astype(compute_dtype)
        w = w.astype(compute_dtype)

    y = _linear_2d(x2, w, bias, out_dtype=out_dtype, tm=tm, tn=tn, tk=tk)
    return y.reshape(*lead, Out)


# ------------------------------------ main --------------------------------------
if __name__ == "__main__":
    N, in_f, out_f = 16, 256, 256
    num_bases, num_relations, relation = 4, 3, 1

    key = jax.random.PRNGKey(0)
    k1, k2, k3, k4, k5, k6 = jax.random.split(key, 6)

    a = math.sqrt(6.0 / (in_f + out_f))
    w_plain = jax.random.uniform(k1, (out_f, in_f), jnp.float32, -a, a)
    b_plain = jax.random.uniform(k2, (out_f,), jnp.float32,
                                 -1.0 / math.sqrt(in_f), 1.0 / math.sqrt(in_f))

    w_bases = jax.random.uniform(k3, (num_bases, out_f, in_f), jnp.float32, -a, a)
    comp = jax.random.uniform(k4, (num_relations, num_bases), jnp.float32)
    fan_in_3d = out_f * in_f   # torch fan_in for a 3-D weight (prod of dims[1:])
    b_bases = jax.random.uniform(k5, (out_f,), jnp.float32,
                                 -1.0 / math.sqrt(fan_in_3d), 1.0 / math.sqrt(fan_in_3d))

    x = jax.random.normal(k6, (N, in_f), jnp.float32)

    # Pure-JAX references (mirror the PyTorch forward exactly).
    ref_plain = x @ w_plain.T + b_plain
    ref_nobias = x @ w_plain.T
    w_eff = (comp[relation][None, :] @ w_bases.reshape(num_bases, -1)
             ).reshape(out_f, in_f)
    ref_basis = x @ w_eff.T + b_bases

    # 1) f32 compute, small tiles -> exercises the full (M, Out, K) reduction grid
    #    and the accumulator init/finalize + bias-at-last-k path: grid = (1, 2, 2).
    y_f32 = linear_w_base_forward(x, w_plain, b_plain, tm=16, tn=128, tk=128,
                                  compute_dtype=jnp.float32)
    # 2) default bf16 compute, default (MXU-sized, then core-split) tiles.
    y_bf16 = linear_w_base_forward(x, w_plain, b_plain)
    # 3) basis mode (combine kernel + matmul), default bf16.
    y_basis = linear_w_base_forward(x, w_bases, b_bases, comp=comp,
                                    relation=relation)
    # 4) bias-free kernel variant, f32 compute.
    y_nobias = linear_w_base_forward(x, w_plain, None, compute_dtype=jnp.float32)
    jax.block_until_ready((y_f32, y_bf16, y_basis, y_nobias))

    assert np.allclose(np.asarray(y_f32), np.asarray(ref_plain),
                       rtol=5e-3, atol=5e-3), "plain mode (f32) mismatch"
    assert np.allclose(np.asarray(y_nobias), np.asarray(ref_nobias),
                       rtol=5e-3, atol=5e-3), "no-bias mode mismatch"
    assert np.allclose(np.asarray(y_bf16), np.asarray(ref_plain),
                       rtol=2e-2, atol=2e-2), "plain mode (bf16) mismatch"
    assert np.allclose(np.asarray(y_basis), np.asarray(ref_basis),
                       rtol=2e-2, atol=2e-2), "basis mode mismatch"
    print("KERNEL_OK")
</pallas_src>

<mosaic_0001>
module attributes {stable_mosaic.version = 11 : i64} {
  func.func @_linear_bias_kernel(%arg0: i32, %arg1: i32, %arg2: i32, %arg3: memref<16x128xf32, #tpu.memory_space<vmem>>, %arg4: memref<128x128xf32, #tpu.memory_space<vmem>>, %arg5: memref<1x128xf32, #tpu.memory_space<vmem>>, %arg6: memref<16x128xf32, #tpu.memory_space<vmem>>, %arg7: memref<16x128xf32, #tpu.memory_space<vmem>>) attributes {dimension_semantics = [#tpu.dimension_semantics<parallel>, #tpu.dimension_semantics<parallel>, #tpu.dimension_semantics<arbitrary>], iteration_bounds = array<i64: 1, 2, 2>, scalar_prefetch = 0 : i64, scratch_operands = 1 : i64, tpu.core_type = #tpu.core_type<tc>, window_params = [{transform_indices = @transform_0, window_bounds = array<i64: 16, 128>}, {transform_indices = @transform_1, window_bounds = array<i64: 128, 128>}, {transform_indices = @transform_2, window_bounds = array<i64: 1, 128>}, {transform_indices = @transform_3, window_bounds = array<i64: 16, 128>}]} {
    %c0_i32 = arith.constant 0 : i32
    %0 = arith.cmpi eq, %arg2, %c0_i32 : i32
    %1 = arith.extui %0 : i1 to i32
    %c0_i32_0 = arith.constant 0 : i32
    %2 = arith.cmpi ne, %1, %c0_i32_0 : i32
    scf.if %2 {
      %cst_9 = arith.constant 0.000000e+00 : f32
      %12 = vector.broadcast %cst_9 : f32 to vector<16x128xf32>
      %c0_10 = arith.constant 0 : index
      %c0_11 = arith.constant 0 : index
      %13 = vector.load %arg7[%c0_10, %c0_11] : memref<16x128xf32, #tpu.memory_space<vmem>>, vector<16x128xf32>
      tpu.vector_store %arg7[%c0_10, %c0_11], %12 {strides = array<i32>} : memref<16x128xf32, #tpu.memory_space<vmem>>, vector<16x128xf32>,
    } else {
    }
    %c0 = arith.constant 0 : index
    %c0_1 = arith.constant 0 : index
    %3 = vector.load %arg7[%c0, %c0_1] : memref<16x128xf32, #tpu.memory_space<vmem>>, vector<16x128xf32>
    %c0_2 = arith.constant 0 : index
    %c0_3 = arith.constant 0 : index
    %4 = vector.load %arg3[%c0_2, %c0_3] : memref<16x128xf32, #tpu.memory_space<vmem>>, vector<16x128xf32>
    %c0_4 = arith.constant 0 : index
    %c0_5 = arith.constant 0 : index
    %5 = vector.load %arg4[%c0_4, %c0_5] : memref<128x128xf32, #tpu.memory_space<vmem>>, vector<128x128xf32>
    %cst = arith.constant dense<0.000000e+00> : vector<16x128xf32>
    %6 = tpu.matmul %4, %5, %cst {dimension_numbers = #tpu.dot_dimension_numbers<[1], [1], [0], [0], [0, 0, 1, 0], [], []>} : vector<16x128xf32>, vector<128x128xf32>, vector<16x128xf32> -> vector<16x128xf32>
    %7 = arith.addf %3, %6 : vector<16x128xf32>
    %c0_6 = arith.constant 0 : index
    %c0_7 = arith.constant 0 : index
    %8 = vector.load %arg7[%c0_6, %c0_7] : memref<16x128xf32, #tpu.memory_space<vmem>>, vector<16x128xf32>
    tpu.vector_store %arg7[%c0_6, %c0_7], %7 {strides = array<i32>} : memref<16x128xf32, #tpu.memory_space<vmem>>, vector<16x128xf32>,
    %c1_i32 = arith.constant 1 : i32
    %9 = arith.cmpi eq, %arg2, %c1_i32 : i32
    %10 = arith.extui %9 : i1 to i32
    %c0_i32_8 = arith.constant 0 : i32
    %11 = arith.cmpi ne, %10, %c0_i32_8 : i32
    scf.if %11 {
      %c0_9 = arith.constant 0 : index
      %c0_10 = arith.constant 0 : index
      %12 = vector.load %arg7[%c0_9, %c0_10] : memref<16x128xf32, #tpu.memory_space<vmem>>, vector<16x128xf32>
      %c0_11 = arith.constant 0 : index
      %c0_12 = arith.constant 0 : index
      %13 = vector.load %arg5[%c0_11, %c0_12] : memref<1x128xf32, #tpu.memory_space<vmem>>, vector<1x128xf32>
      %14 = vector.broadcast %13 : vector<1x128xf32> to vector<16x128xf32>
      %15 = arith.addf %12, %14 : vector<16x128xf32>
      %c0_13 = arith.constant 0 : index
      %c0_14 = arith.constant 0 : index
      %16 = vector.load %arg6[%c0_13, %c0_14] : memref<16x128xf32, #tpu.memory_space<vmem>>, vector<16x128xf32>
      tpu.vector_store %arg6[%c0_13, %c0_14], %15 {strides = array<i32>} : memref<16x128xf32, #tpu.memory_space<vmem>>, vector<16x128xf32>,
    } else {
    }
    return
  }
  func.func @transform_0(%arg0: i32, %arg1: i32, %arg2: i32) -> (i32, i32) {
    %c0_i32 = arith.constant 0 : i32
    return %arg0, %arg2 : i32, i32
  }
  func.func @transform_1(%arg0: i32, %arg1: i32, %arg2: i32) -> (i32, i32) {
    %c0_i32 = arith.constant 0 : i32
    return %arg1, %arg2 : i32, i32
  }
  func.func @transform_2(%arg0: i32, %arg1: i32, %arg2: i32) -> (i32, i32) {
    %c0_i32 = arith.constant 0 : i32
    %c0_i32_0 = arith.constant 0 : i32
    return %c0_i32, %arg1 : i32, i32
  }
  func.func @transform_3(%arg0: i32, %arg1: i32, %arg2: i32) -> (i32, i32) {
    %c0_i32 = arith.constant 0 : i32
    return %arg0, %arg1 : i32, i32
  }
}

</mosaic_0001>

<bundles_post_ra>
// kernel: tpu_custom_call.1
= control target key start
LH: loop header
LB: loop body
LE: loop exit
PB: predicated region body
PF: predicated region fallthrough
CT: control target
= control target key end

     0   :  { %s1339_s0 = inlined_call_operand.hbm [shape: f32[16,256], index: 0, kind: input, shape index: {}]   ;;  %s1340_s1 = inlined_call_operand.hbm [shape: f32[256,256], index: 1, kind: input, shape index: {}]   ;;  %s1341_s2 = inlined_call_operand.vmem [shape: f32[1,256], index: 2, kind: input, shape index: {}]   ;;  %s1342_s3 = inlined_call_operand.hbm [shape: f32[16,256], index: 3, kind: output, shape index: {}]  }
   0x1   :  { %1353 = sst [smem:[#allocation18_spill]] %s1339_s0 }
   0x2   :  { %1354 = sst [smem:[#allocation19_spill]] %s1341_s2 }
   0x3   :  { %1355 = sst [smem:[#allocation20_spill]] %s1342_s3 }
   0x4   :  { %8 = vsyncpa [#allocation4], 0 }
   0x5   :  { %10 = vsyncpa [#allocation4 + $0x1], 0 }
   0x6   :  { %11 = vsyncpa [#allocation7], 0 }
   0x7   :  { %13 = vsyncpa [#allocation7 + $0x1], 0 }
   0x8   :  { %14 = vsyncpa [#allocation5], 0 }
   0x9   :  { %16 = vsyncpa [#allocation5 + $0x1], 0  ;;  %s987_s12 = smov 0   ;;  %s989_s13 = smov 0  }
   0xa   :  { %s991_s14 = smov 0   ;;  %s993_s15 = smov 0  }
   0xb   :  { %s995_s16 = smov 0   ;;  %s997_s17 = smov 0  }
   0xc   :  { %s999_s18 = smov 0   ;;  %s1001_s19 = smov 0  }
   0xd   :  { %s1003_s20 = smov 0   ;;  %s1005_s21 = smov 0  }
   0xe   :  { %s1007_s22 = smov 0   ;;  %s1009_s23 = smov 0  }
   0xf   :  { %s1011_s24 = smov 0   ;;  %s1013_s25 = smov 0  }
  0x10 LB: > { %1356 = sst [smem:[#allocation12_spill]] %s935_s20  ;;  %s538_s26 = sadd.s32 4294967295, %s955_s25   ;;  %s955_s25 = sphi %s1013_s25, %s22_s25   ;;  %s951_s24 = sphi %s1011_s24, %s1391_s24   ;;  %s947_s23 = sphi %s1009_s23, %s1403_s23   ;;  %s943_s22 = sphi %s1007_s22, %s1402_s22   ;;  %s939_s21 = sphi %s1005_s21, %s1401_s21   ;;  %s935_s20 = sphi %s1003_s20, %s1388_s20   ;;  %s931_s19 = sphi %s1001_s19, %s1400_s19   ;;  %s927_s18 = sphi %s999_s18, %s1399_s18   ;;  %s923_s17 = sphi %s997_s17, %s1398_s17   ;;  %s919_s16 = sphi %s995_s16, %s1397_s16   ;;  %s915_s15 = sphi %s993_s15, %s1396_s15   ;;  %s911_s14 = sphi %s991_s14, %s1395_s14   ;;  %s907_s13 = sphi %s989_s13, %s1394_s13   ;;  %s903_s12 = sphi %s987_s12, %s1393_s12  }
  0x11   : > { %1357 = sst [smem:[#allocation13_spill]] %s939_s21  ;;  %s34_s27 = sadd.s32 1, %s947_s23 }
  0x12   : > { %1358 = sst [smem:[#allocation14_spill]] %s951_s24  ;;  %p1057_p0 = scmp.ge.s32.totalorder %s34_s27, 2 }
  0x13   : > { %s50_s29 = sadd.s32 1, %s935_s20  ;;  %p57_p1 = scmp.ne.s32.totalorder %s935_s20, %s931_s19 }
  0x14   : > { %p1346_p2 = scmp.eq.s32.totalorder %s955_s25, 0  ;;  %s1405_s27 = smov (%p1057_p0, %s34_s27), 0 }
  0x15   : > { %1360 = sst [smem:[#allocation15_spill]] %s1405_s27  ;;  %p63_p4 = scmp.ne.s32.totalorder %s931_s19, %s927_s18 }
  0x16   : > { %p1071_p3 = por %p1346_p2, %p57_p1  ;;  %s1078_s4 = ssub.s32 %s947_s23, %s1405_s27 }
  0x17   : > { %p1080_p5 = scmp.eq.s32.totalorder %s538_s26, 0  ;;  %p48_p6 = scmp.eq.s32.totalorder %s1078_s4, 0 }
  0x18   : > { %p1085_p7 = scmp.eq.s32.totalorder %s538_s26, 3  ;;  %p630_p9 = scmp.lt.s32.totalorder %s955_s25, 4 }
  0x19   : > { %p1091_p8 = por %p1080_p5, %p63_p4  ;;  %s169_s9 = sand.u32 1, %s935_s20  }
  0x1a   : > { %s1096_s8 = scalar_select %p48_p6, %s935_s20, %s50_s29  }
  0x1b   : > { %s1364_s7 = scalar_select %p1091_p8, 1, 0 }
  0x1c   : > { %1365 = sst [smem:[#allocation16_spill]] %s1096_s8  ;;  %s542_s10 = sshll.u32 %s169_s9, 4 }
  0x1d   : > { %s543_s11 = sshll.u32 %s947_s23, 7  ;;  %s1366_s0 = sld [smem:[#allocation18_spill]] }
  0x1e   : > { %s173_s21 = scalar_lea.vmem [#allocation3], %s542_s10  ;;  %p1108_p10 = pnand %p630_p9, %p1071_p3 }
  0x1f   : > { %s182_s26 = sshll.u32 %s173_s21, 4  ;;  %s170_s29 = scalar_lea.sflag [#allocation4], %s169_s9  ;;  %s183_s26 = int_to_ptr.vmem [resolvable:$true] %s182_s26 }
  0x20   : > { %p753_p11 = pneg %p1108_p10  ;;  %s764_s8 = scalar_lea.vmem %s183_s26, 256 }
  0x21   : > { %p765_p12 = scmp.ne.s32.totalorder %s183_s26, %s764_s8  ;;  %s957_s20 = smov [#allocation3]  }
  0x22   : > { %s769_s27 = sshll.u32 %s957_s20, 4  ;;  %s770_s27 = int_to_ptr.vmem [resolvable:$false] %s769_s27 }
  0x23   : > { %s181_s3 = scalar_lea.hbm %s1366_s0, %s543_s11  ;;  %p767_p13 = pnand %p765_p12, %p753_p11 }
  0x24   : > { %s771_s10 = scalar_lea.vmem %s770_s27, 512  ;;  %p772_p4 = scmp.lt.s32.totalorder %s183_s26, %s770_s27 }
  0x25   : > { %p768_p1 = pneg %p767_p13  ;;  %p773_p6 = scmp.lt.s32.totalorder %s771_s10, %s764_s8 }
  0x27   : > { %p774_p2 = por %p773_p6, %p772_p4 }
  0x29   : > { %p775_p8 = pnand %p774_p2, %p768_p1 }
  0x2b   : > { %778 = shalt.err (!%p775_p8)
}
  0x2c   : > { %s1348_s21 = smov 256   ;;  %s1349_s20 = smov 128  }
  0x2d   : > { %s1350_s30 = smov 8   ;;  %p548_p2 = scmp.ge.s32.totalorder %s955_s25, 1 }
  0x2e   : > { %622 = dma.hbm_to_vmem [thread:$0]  (!%p1108_p10), %s181_s3, 256, %s183_s26, %s170_s29, %s1348_s21, %s1349_s20, %s1350_s30  }
  0x2f   : > { %p219_p3 = scmp.lt.s32.totalorder %s955_s25, 5  ;;  %s539_s9 = sadd.s32 4294967294, %s955_s25  }
  0x30   : > { %s37_s11 = sadd.s32 1, %s951_s24  ;;  %s78_s18 = sadd.s32 1, %s923_s17 }
  0x31   : > { %p1121_p8 = pnand %p548_p2, %p219_p3  ;;  %s1407_s11 = smov (!%p1057_p0, %s37_s11), %s951_s24 }
  0x32   : > { %p85_p11 = scmp.ne.s32.totalorder %s923_s17, %s919_s16  ;;  %p91_p10 = scmp.ne.s32.totalorder %s919_s16, %s915_s15 }
  0x33   : > { %p39_p12 = scmp.ge.s32.totalorder %s1407_s11, 2  ;;  %s132_s2 = sadd.s32 1, %s911_s14 }
  0x34   : > { %p1369_p13 = scmp.eq.s32.totalorder %s955_s25, 0  ;;  %p1144_p4 = por %p91_p10, %p1080_p5 }
  0x35   : > { %s1409_s11 = smov (%p39_p12, %s1407_s11), 0  ;;  %p142_p0 = scmp.ne.s32.totalorder %s911_s14, %s907_s13 }
  0x36   : > { %p1138_p1 = por %p85_p11, %p1369_p13  ;;  %1372 = sst [smem:[#allocation17_spill]] %s1409_s11 }
  0x37   : > { %p148_p6 = scmp.ne.s32.totalorder %s907_s13, %s903_s12  ;;  %s73_s15 = ssub.s32 %s951_s24, %s1409_s11 }
  0x38   : > { %p149_p2 = scmp.eq.s32.totalorder %s539_s9, 3  ;;  %s75_s28 = sor.u32 %s73_s15, %s1078_s4 }
  0x39   : > { %p130_p3 = scmp.eq.s32.totalorder %s73_s15, 0  ;;  %p76_p11 = scmp.eq.s32.totalorder %s75_s28, 0 }
  0x3a   : > { %p1159_p13 = por %p1085_p7, %p142_p0  ;;  %p1169_p5 = por %p149_p2, %p148_p6 }
  0x3b   : > { %s1164_s29 = scalar_select %p130_p3, %s911_s14, %s132_s2  }
  0x3c   : > { %s1167_s27 = scalar_select %p76_p11, %s923_s17, %s78_s18  }
  0x3d   : > { %s1374_s10 = scalar_select %p1169_p5, 1, 0 }
  0x3e   : > { %s192_s21 = sand.u32 1, %s923_s17   ;;  %s559_s4 = sshll.u32 %s951_s24, 5 }
  0x3f   : > { %s544_s9 = sshll.u32 %s192_s21, 7  ;;  %s202_s20 = sadd.s32 %s947_s23, %s559_s4 }
  0x40   : > { %s196_s30 = scalar_lea.vmem [#allocation6], %s544_s9  ;;  %s547_s28 = sshll.u32 %s202_s20, 7 }
  0x41   : > { %s205_s15 = sshll.u32 %s196_s30, 4  ;;  %s204_s11 = scalar_lea.hbm %s1340_s1, %s547_s28  ;;  %s206_s15 = int_to_ptr.vmem [resolvable:$true] %s205_s15 }
  0x42   : > { %p1183_p7 = pnand %p630_p9, %p1138_p1  ;;  %s193_s2 = scalar_lea.sflag [#allocation7], %s192_s21 }
  0x43   : > { %s792_s24 = scalar_lea.vmem %s206_s15, 2048  ;;  %s961_s20 = smov [#allocation6]  }
  0x44   : > { %p781_p10 = pneg %p1183_p7  ;;  %p793_p12 = scmp.ne.s32.totalorder %s206_s15, %s792_s24 }
  0x45   : > { %s797_s30 = sshll.u32 %s961_s20, 4  ;;  %s798_s30 = int_to_ptr.vmem [resolvable:$false] %s797_s30 }
  0x46   : > { %p795_p0 = pnand %p793_p12, %p781_p10  ;;  %s799_s9 = scalar_lea.vmem %s798_s30, 4096 }
  0x47   : > { %p800_p2 = scmp.lt.s32.totalorder %s206_s15, %s798_s30  ;;  %p801_p3 = scmp.lt.s32.totalorder %s799_s9, %s792_s24 }
  0x48   : > { %p796_p6 = pneg %p795_p0 }
  0x49   : > { %p802_p11 = por %p801_p3, %p800_p2 }
  0x4b   : > { %p803_p5 = pnand %p802_p11, %p796_p6 }
  0x4d   : > { %806 = shalt.err (!%p803_p5)
}
  0x4e   : > { %s1376_s0 = smov 8   ;;  %s1377_s3 = smov 128  }
  0x4f   : > { %s1378_s21 = smov 256   ;;  %223 = sbr.rel (%p1121_p8) target bundleno = 405 (0x195), region = 32 }
  0x50   : > { %625 = dma.hbm_to_vmem [thread:$0]  (!%p1183_p7), %s204_s11, 2048, %s206_s15, %s193_s2, %s1378_s21, %s1377_s3, %s1376_s0  }
  0x51   : > { %s225_s4 = sand.u32 (!%p1121_p8), 1, %s931_s19   ;;  %p1379_p9 = scmp.ne.s32.totalorder (!%p1121_p8), %s1364_s7, 0 }
  0x52   : > { %s1197_s28 = sshll.u32 (!%p1121_p8), %s225_s4, 4  ;;  %s226_s6 = scalar_lea.sflag (!%p1121_p8), [#allocation4], %s225_s4 }
  0x53   : > { %s229_s24 = scalar_lea.vmem (!%p1121_p8), [#allocation3], %s1197_s28 }
  0x54   : > { %890 = dma.done.wait (%p1379_p9), %s226_s6, 256  }
  0x55   : > { %892 = vsyncadd (%p1379_p9), %s226_s6, 4294967040  ;;  %s234_s18 = sand.u32 1, %s919_s16  }
  0x56   : > { %s550_s11 = sshll.u32 %s234_s18, 7  ;;  %s235_s15 = scalar_lea.sflag [#allocation7], %s234_s18 }
  0x57   : > { %s1205_s8 = scalar_lea.vmem [#allocation6], %s550_s11 }
  0x58   : > { %894 = dma.done.wait (%p1144_p4), %s235_s15, 2048  }
  0x59   : > { %896 = vsyncadd (%p1144_p4), %s235_s15, 4294965248  ;;  %s266_s2 = sand.u32 1, %s907_s13   ;;  %p271_p8 = scmp.lt.s32.totalorder %s943_s22, 1 }
  0x5a   : > { %s551_s7 = sshll.u32 %s266_s2, 4  ;;  %s1380_s0 = sld [smem:[#allocation19_spill]] }
  0x5b   : > { %s1216_s20 = scalar_select %p271_p8, %s943_s22, 1 }
  0x5c   : > { %s1222_s21 = scalar_lea.vmem [#allocation8], %s551_s7  ;;  %s1381_s4 = sld [smem:[#allocation13_spill]] }
  0x60   : > { %s273_s3 = scalar_lea.vmem %s1380_s0, %s1216_s20 }
  0x62   : > { %p552_p1 = scmp.ne.s32.totalorder %s1381_s4, 0 }
  0x64   : > { %278 = sbr.rel (%p552_p1) target bundleno = 107 (0x6b), region = 44 }
  0x69   : > { %v962_v0 = vmov 0.0  }
  0x6a   : > { %279 = vst [vmem:[#allocation2] sm:$0xff] %v962_v0  ;;  %280 = vst [vmem:[#allocation2 + $0x8] sm:$0xff] %v962_v0 }
  0x6b PF: > { %v300_v1 = vld [vmem:[%s1205_s8 + $0x78] sm:$0xff]  ;;  %v299_v2 = vld [vmem:[%s1205_s8 + $0x70] sm:$0xff]  ;;  %v298_v3 = vld [vmem:[%s1205_s8 + $0x68] sm:$0xff]  ;;  %s1382_s26 = sld [smem:[#allocation13_spill]] }
  0x6c   : > { %578 = vmatprep.subr.mxu0 %v300_v1  ;;  %v283_v4 = vld [vmem:[%s229_s24] sm:$0xff]  ;;  %v296_v6 = vld [vmem:[%s1205_s8 + $0x58] sm:$0xff]  ;;  %v294_v8 = vld [vmem:[%s1205_s8 + $0x48] sm:$0xff] }
  0x6d   : > { %579 = vmatpush3.xpose.msra.mxu0 %v300_v1  ;;  %610 = vmatprep.mubr.f32.mxu0 %v283_v4  ;;  %v297_v5 = vld [vmem:[%s1205_s8 + $0x60] sm:$0xff]  ;;  %v295_v7 = vld [vmem:[%s1205_s8 + $0x50] sm:$0xff]  ;;  %v292_v10 = vld [vmem:[%s1205_s8 + $0x38] sm:$0xff] }
  0x6e   : > { %580 = vmatprep.subr.mxu0 %v299_v2  ;;  %v293_v9 = vld [vmem:[%s1205_s8 + $0x40] sm:$0xff]  ;;  %v291_v11 = vld [vmem:[%s1205_s8 + $0x30] sm:$0xff]  ;;  %v290_v12 = vld [vmem:[%s1205_s8 + $0x28] sm:$0xff] }
  0x6f   : > { %v289_v13 = vld [vmem:[%s1205_s8 + $0x20] sm:$0xff]  ;;  %v288_v14 = vld [vmem:[%s1205_s8 + $0x18] sm:$0xff]  ;;  %v287_v15 = vld [vmem:[%s1205_s8 + $0x10] sm:$0xff] }
  0x70   : > { %v286_v16 = vld [vmem:[%s1205_s8 + $0x8] sm:$0xff]  ;;  %v285_v17 = vld [vmem:[%s1205_s8] sm:$0xff] }
  0x71   : > { %581 = vmatpush3.xpose.msra.mxu0 %v299_v2  ;;  %v284_v18 = vld [vmem:[%s229_s24 + $0x8] sm:$0xff]  ;;  %v281_v21 = vld [vmem:[#allocation2] sm:$0xff]  ;;  %p553_p4 = scmp.ne.s32.totalorder %s1382_s26, 1 }
  0x72   : > { %582 = vmatprep.subr.mxu0 %v298_v3  ;;  %v282_v19 = vld [vmem:[#allocation2 + $0x8] sm:$0xff] }
  0x75   : > { %583 = vmatpush3.xpose.msra.mxu0 %v298_v3 }
  0x76   : > { %584 = vmatprep.subr.mxu0 %v297_v5 }
  0x79   : > { %585 = vmatpush3.xpose.msra.mxu0 %v297_v5 }
  0x7a   : > { %586 = vmatprep.subr.mxu0 %v296_v6 }
  0x7d   : > { %587 = vmatpush3.xpose.msra.mxu0 %v296_v6 }
  0x7e   : > { %588 = vmatprep.subr.mxu0 %v295_v7 }
  0x81   : > { %589 = vmatpush3.xpose.msra.mxu0 %v295_v7 }
  0x82   : > { %590 = vmatprep.subr.mxu0 %v294_v8 }
  0x85   : > { %591 = vmatpush3.xpose.msra.mxu0 %v294_v8 }
  0x86   : > { %592 = vmatprep.subr.mxu0 %v293_v9 }
  0x89   : > { %593 = vmatpush3.xpose.msra.mxu0 %v293_v9 }
  0x8a   : > { %594 = vmatprep.subr.mxu0 %v292_v10 }
  0x8d   : > { %595 = vmatpush3.xpose.msra.mxu0 %v292_v10 }
  0x8e   : > { %596 = vmatprep.subr.mxu0 %v291_v11 }
  0x91   : > { %597 = vmatpush3.xpose.msra.mxu0 %v291_v11 }
  0x92   : > { %598 = vmatprep.subr.mxu0 %v290_v12 }
  0x95   : > { %599 = vmatpush3.xpose.msra.mxu0 %v290_v12 }
  0x96   : > { %600 = vmatprep.subr.mxu0 %v289_v13 }
  0x99   : > { %601 = vmatpush3.xpose.msra.mxu0 %v289_v13 }
  0x9a   : > { %602 = vmatprep.subr.mxu0 %v288_v14 }
  0x9d   : > { %603 = vmatpush3.xpose.msra.mxu0 %v288_v14 }
  0x9e   : > { %604 = vmatprep.subr.mxu0 %v287_v15 }
  0xa1   : > { %605 = vmatpush3.xpose.msra.mxu0 %v287_v15 }
  0xa2   : > { %606 = vmatprep.subr.mxu0 %v286_v16 }
  0xa5   : > { %607 = vmatpush3.xpose.msra.mxu0 %v286_v16 }
  0xa6   : > { %608 = vmatprep.subr.mxu0 %v285_v17 }
  0xa9   : > { %609 = vmatpush3.xpose.msra.mxu0 %v285_v17 }
  0xac   : > { %611 = vmatmul.mubr.f32.vlgmr.msra.gmra.mxu0 %v284_v18 }
 0x16c   : > { %v612_v20 = vpop.f32.mrf.mxu0 }
 0x16d   : > { %v377_v22 = vadd.f32 %v612_v20, %v282_v19  ;;  %383 = sbr.rel (%p553_p4) target bundleno = 380 (0x17c), region = 48 }
 0x16e   : > { %v367_v23 = vpop.f32.mrf.mxu0 }
 0x16f   : > { %379 = vst [vmem:[#allocation2 + $0x8] sm:$0xff] %v377_v22  ;;  %v376_v24 = vadd.f32 %v367_v23, %v281_v21 }
 0x171   : > { %378 = vst [vmem:[#allocation2] sm:$0xff] %v376_v24 }
 0x172   : > { %v554_v26 = vld [vmem:[%s273_s3] ss:$0 sm:$0xff] }
 0x176   : > { %v385_v27 = vld [vmem:[#allocation2 + $0x8] sm:$0xff] }
 0x177   : > { %v394_v29 = vadd.f32 %v554_v26, %v385_v27 }
 0x178   : > { %v384_v25 = vld [vmem:[#allocation2] sm:$0xff] }
 0x179   : > { %v393_v28 = vadd.f32 %v554_v26, %v384_v25  ;;  %396 = vst [vmem:[%s1222_s21 + $0x8] sm:$0xff] %v394_v29 }
 0x17b   : > { %395 = vst [vmem:[%s1222_s21] sm:$0xff] %v393_v28 }
 0x17c PF: > { %s556_s28 = sshll.u32 %s943_s22, 7  ;;  %s1384_s8 = sld [smem:[#allocation20_spill]] }
 0x17d   : > { %s413_s20 = sshll.u32 %s1222_s21, 4  ;;  %s1264_s30 = scalar_lea.sflag [#allocation5], %s266_s2  ;;  %s1260_s20 = int_to_ptr.vmem [resolvable:$true] %s413_s20 }
 0x17e   : > { %s807_s9 = scalar_lea.vmem %s1260_s20, 256  ;;  %s963_s22 = smov [#allocation8]  }
 0x17f   : > { %p808_p5 = scmp.ne.s32.totalorder %s1260_s20, %s807_s9  ;;  %s811_s0 = sshll.u32 %s963_s22, 4  ;;  %s812_s0 = int_to_ptr.vmem [resolvable:$false] %s811_s0 }
 0x180   : > { %s813_s3 = scalar_lea.vmem %s812_s0, 512  ;;  %p814_p12 = scmp.lt.s32.totalorder %s1260_s20, %s812_s0 }
 0x181   : > { %p809_p7 = pnand %p808_p5, %p1159_p13  ;;  %p815_p0 = scmp.lt.s32.totalorder %s813_s3, %s807_s9 }
 0x182   : > { %s1257_s7 = scalar_lea.hbm %s1384_s8, %s556_s28 }
 0x183   : > { %p810_p10 = pneg %p809_p7  ;;  %p816_p6 = por %p815_p0, %p814_p12 }
 0x185   : > { %p817_p2 = pnand %p816_p6, %p810_p10 }
 0x187   : > { %820 = shalt.err (!%p817_p2)
}
 0x188   : > { %s821_s2 = scalar_lea.hbm %s1257_s7, 256  ;;  %s825_s26 = scalar_lea.hbm %s1384_s8, 512 }
 0x189   : > { %p822_p3 = scmp.ne.s32.totalorder %s1257_s7, %s821_s2  ;;  %p826_p8 = scmp.lt.s32.totalorder %s1257_s7, %s1384_s8 }
 0x18a   : > { %p827_p1 = scmp.lt.s32.totalorder %s825_s26, %s821_s2 }
 0x18b   : > { %p823_p11 = pnand %p822_p3, %p1159_p13 }
 0x18c   : > { %p828_p4 = por %p827_p1, %p826_p8 }
 0x18d   : > { %p824_p9 = pneg %p823_p11 }
 0x18f   : > { %p829_p5 = pnand %p828_p4, %p824_p9 }
 0x191   : > { %832 = shalt.err (!%p829_p5)
}
 0x192   : > { %s964_s11 = smov 128   ;;  %s965_s28 = smov 256  }
 0x193   : > { %s966_s24 = smov 8  }
 0x194   : > { %617 = dma.vmem_to_hbm [thread:$0]  (%p1159_p13), %s1260_s20, 256, %s1257_s7, %s1264_s30, %s964_s11, %s965_s28, %s966_s24  }
 0x195 PF: > { %p631_p7 = scmp.ge.s32.totalorder %s955_s25, 2  ;;  %s428_s15 = sand.u32 1, %s903_s12  }
 0x196   : > { %p1385_p10 = scmp.ne.s32.totalorder %s1374_s10, 0  ;;  %s429_s9 = scalar_lea.sflag [#allocation5], %s428_s15 }
 0x198   : > { %p627_p12 = pnand %p631_p7, %p1385_p10 }
 0x19a   : > { %p628_p0 = pneg %p627_p12 }
 0x19c   : > { %898 = dma.done.wait (%p628_p0), %s429_s9, 256  }
 0x19d   : > { %900 = vsyncadd (%p628_p0), %s429_s9, 4294967040  ;;  %s22_s25 = sadd.s32 1, %s955_s25   ;;  %s1387_s5 = sld [smem:[#allocation12_spill]] }
 0x19e   : > { %p1292_p6 = scmp.ge.s32.totalorder %s22_s25, 6   ;;  %s1388_s20 = sld [smem:[#allocation16_spill]] }
 0x19f   : > { %s1389_s10 = sld [smem:[#allocation14_spill]]  ;;  %s1393_s12 = smov %s907_s13 }
 0x1a0   : > { %s1390_s7 = sld [smem:[#allocation15_spill]]  ;;  %s1394_s13 = smov %s911_s14 }
 0x1a1   : > { %s1391_s24 = sld [smem:[#allocation17_spill]]  ;;  %s1395_s14 = smov %s1164_s29 }
 0x1a2   : > { %s1396_s15 = smov %s919_s16  ;;  %s1397_s16 = smov %s923_s17 }
 0x1a3   : > { %s1398_s17 = smov %s1167_s27  ;;  %s1399_s18 = smov %s931_s19 }
 0x1a4   : > { %s1400_s19 = smov %s1387_s5  ;;  %s1401_s21 = smov %s947_s23 }
 0x1a5   : > { %s1402_s22 = smov %s1389_s10  ;;  %21 = sbr.rel (!%p1292_p6) target bundleno = 16 (0x10), region = 101 }
 0x1a6   : > { %s1403_s23 = smov %s1390_s7 }
 0x1aa   :  { %434 = vsyncpa [#allocation4], 1 }
 0x1ab   :  { %436 = vsyncpa [#allocation4 + $0x1], 1 }
 0x1ac   :  { %437 = vsyncpa [#allocation7], 1 }
 0x1ad   :  { %439 = vsyncpa [#allocation7 + $0x1], 1 }
 0x1ae   :  { %440 = vsyncpa [#allocation5], 1 }
 0x1af   :  { %442 = vsyncpa [#allocation5 + $0x1], 1 }

</bundles_post_ra>
